<compile_context>
chip_gen: v7x
topology: tpu7x:2x2x1
jax: 0.10.0
libtpu: 0.0.40
codegen_flags: <defaults>
</compile_context>

<pallas_src>
import functools

import jax
import jax.numpy as jnp
from jax.experimental import pallas as pl
from jax.experimental.pallas import tpu as pltpu


def _round_up(x, m):
    return ((x + m - 1) // m) * m


def _label_smooth_loss_kernel(x_ref, tgt_ref, out_ref, *, smoothing, n_valid, tile_rows):
    """One grid step handles `tile_rows` rows of logits over the full class dim.

    x_ref   : (TN, C)     logits tile, native dtype (f32/bf16), streamed
    tgt_ref : (N_pad, 1)  i32 target class indices, resident across the grid
    out_ref : (TN, 1)     f32 per-row loss for this step's rows
    """
    pid = pl.program_id(0)

    x = x_ref[...].astype(jnp.float32)                  # per-vreg upcast (cheap VPU filler)
    tn, c = x.shape
    a = smoothing / (c - 1.0)                            # off-target weight
    b = 1.0 - smoothing                                  # on-target weight

    # Row-wise stable logsumexp.
    m = jnp.max(x, axis=-1, keepdims=True)                               # (TN, 1)
    # TODO(synk): if profiling shows the single EUP slot (exp) binds on v6e/v7x,
    # switch to bf16 exp with f32 accumulation here.
    lse = m + jnp.log(jnp.sum(jnp.exp(x - m), axis=-1, keepdims=True))   # (TN, 1)

    # Per-row targets from the resident block (sublane-aligned dynamic slice).
    start = pl.multiple_of(pid * tile_rows, tile_rows)
    tgt = tgt_ref[pl.ds(start, tn), :]                                   # (TN, 1)

    # Fused weighted reduction: sum(w*x) = a*sum(x) + (b-a)*x[target].
    lane = jax.lax.broadcasted_iota(jnp.int32, (tn, c), 1)               # (TN, C)
    w = a + (b - a) * (lane == tgt).astype(jnp.float32)                  # (TN, C)
    wsum = jnp.sum(x * w, axis=-1, keepdims=True)                        # (TN, 1)

    # -(w * log_softmax(x)).sum(-1) == lse * sum(w) - sum(w*x) == lse - sum(w*x)
    loss_rows = lse - wsum                                               # (TN, 1)

    # Zero rows beyond N.  The ragged last tile's padding rows read unspecified
    # data; they are also never written back to HBM, this is belt-and-braces.
    row = start + jax.lax.broadcasted_iota(jnp.int32, (tn, 1), 0)
    out_ref[...] = jnp.where(row < n_valid, loss_rows, 0.0)


def label_smooth_loss(logits, target, smoothing=0.0, tile_rows=256, vmem_limit_bytes=None):
    """logits: (N, C) float (f32 or bf16), target: (N,) int -> scalar f32 loss."""
    n, c = logits.shape
    if c < 2:
        raise ValueError("LabelSmoothLoss needs at least 2 classes (smoothing/(C-1)).")

    # Row tile: sublane multiple (16 for 16-bit dtypes), at most `tile_rows`.
    sub = 16 if logits.dtype.itemsize == 2 else 8
    tn = min(_round_up(int(tile_rows), sub), _round_up(n, sub))
    grid = pl.cdiv(n, tn)
    n_pad = grid * tn

    # Targets are tiny (N*4 bytes); pad them to the grid extent and keep the
    # whole array resident in VMEM (one small DMA instead of per-tile streams).
    tgt2d = target.astype(jnp.int32).reshape(n, 1)
    if n_pad != n:
        tgt2d = jnp.pad(tgt2d, ((0, n_pad - n), (0, 0)))

    kernel = functools.partial(
        _label_smooth_loss_kernel,
        smoothing=float(smoothing),
        n_valid=n,
        tile_rows=tn,
    )

    compiler_kwargs = {}
    if vmem_limit_bytes is not None:
        compiler_kwargs["vmem_limit_bytes"] = int(vmem_limit_bytes)

    row_losses = pl.pallas_call(
        kernel,
        out_shape=jax.ShapeDtypeStruct((n, 1), jnp.float32),
        grid_spec=pltpu.PrefetchScalarGridSpec(
            num_scalar_prefetch=0,
            grid=(grid,),
            in_specs=[
                pl.BlockSpec((tn, c), lambda i: (i, 0)),       # streamed logits rows
                pl.BlockSpec((n_pad, 1), lambda i: (0, 0)),    # resident targets
            ],
            out_specs=pl.BlockSpec((tn, 1), lambda i: (i, 0)),  # per-row losses
        ),
        compiler_params=pltpu.CompilerParams(
            # Each tile writes its own output rows -> independent steps,
            # megacore-shardable on v7x.
            dimension_semantics=("parallel",),
            **compiler_kwargs,
        ),
        cost_estimate=pl.CostEstimate(
            flops=int(6 * n * c),
            transcendentals=int(n * c + n),
            bytes_accessed=int(n * c * logits.dtype.itemsize + n_pad * 4 + n * 4),
        ),
    )(logits, tgt2d)

    # Tiny (N, 1) reduction + the 1/N of the mean, outside the kernel.
    return jnp.sum(row_losses) * (1.0 / n)


def label_smooth_loss_reference(logits, target, smoothing=0.0):
    """Pure-JAX reference mirroring the PyTorch forward exactly."""
    c = logits.shape[-1]
    logp = jax.nn.log_softmax(logits.astype(jnp.float32), axis=-1)
    onehot = target[:, None] == jnp.arange(c)[None, :]
    weight = jnp.where(onehot, 1.0 - smoothing, smoothing / (c - 1.0)).astype(jnp.float32)
    return jnp.mean(jnp.sum(-weight * logp, axis=-1))


if __name__ == "__main__":
    # Small shapes consistent with a classification loss: batch=8, classes=32.
    N, C = 8, 32
    smoothing = 0.1

    key = jax.random.PRNGKey(0)
    k_x, k_t = jax.random.split(key)
    logits = jax.random.normal(k_x, (N, C), dtype=jnp.float32)
    target = jax.random.randint(k_t, (N,), 0, C, dtype=jnp.int32)

    loss = label_smooth_loss(logits, target, smoothing=smoothing)
    loss = jax.block_until_ready(loss)

    ref = label_smooth_loss_reference(logits, target, smoothing=smoothing)
    assert loss.shape == ()
    assert jnp.allclose(loss, ref, atol=1e-4, rtol=1e-4), (float(loss), float(ref))

    print("KERNEL_OK")
</pallas_src>

<mosaic_0001>
module attributes {stable_mosaic.version = 11 : i64} {
  func.func @_label_smooth_loss_kernel(%arg0: i32, %arg1: memref<8x32xf32, #tpu.memory_space<vmem>>, %arg2: memref<8x1xi32, #tpu.memory_space<vmem>>, %arg3: memref<8x1xf32, #tpu.memory_space<vmem>>) attributes {dimension_semantics = [#tpu.dimension_semantics<parallel>], iteration_bounds = array<i64: 1>, scalar_prefetch = 0 : i64, scratch_operands = 0 : i64, tpu.core_type = #tpu.core_type<tc>, window_params = [{transform_indices = @transform_0, window_bounds = array<i64: 8, 32>}, {pipeline_mode = #tpu.pipeline_mode<synchronous>, transform_indices = @transform_1, window_bounds = array<i64: 8, 1>}, {transform_indices = @transform_2, window_bounds = array<i64: 8, 1>}]} {
    %c0 = arith.constant 0 : index
    %c0_0 = arith.constant 0 : index
    %0 = vector.load %arg1[%c0, %c0_0] : memref<8x32xf32, #tpu.memory_space<vmem>>, vector<8x32xf32>
    %cst = arith.constant dense<0xFF800000> : vector<8xf32>
    %1 = vector.multi_reduction <maximumf>, %0, %cst [1] : vector<8x32xf32> to vector<8xf32>
    %2 = vector.shape_cast %1 : vector<8xf32> to vector<8x1xf32>
    %3 = vector.broadcast %2 : vector<8x1xf32> to vector<8x32xf32>
    %4 = arith.subf %0, %3 : vector<8x32xf32>
    %5 = math.exp %4 : vector<8x32xf32>
    %cst_1 = arith.constant dense<0.000000e+00> : vector<8xf32>
    %6 = vector.multi_reduction <add>, %5, %cst_1 [1] : vector<8x32xf32> to vector<8xf32>
    %7 = vector.shape_cast %6 : vector<8xf32> to vector<8x1xf32>
    %8 = math.log %7 : vector<8x1xf32>
    %9 = arith.addf %2, %8 : vector<8x1xf32>
    %c8_i32 = arith.constant 8 : i32
    %10 = arith.muli %arg0, %c8_i32 : i32
    %11 = tpu.assume_multiple %10, 8 : i32
    %12 = arith.index_cast %11 : i32 to index
    %c0_2 = arith.constant 0 : index
    %13 = vector.load %arg2[%12, %c0_2] : memref<8x1xi32, #tpu.memory_space<vmem>>, vector<8x1xi32>
    %14 = tpu.iota {dimensions = array<i32: 1>} : vector<8x32xi32>
    %15 = vector.broadcast %13 : vector<8x1xi32> to vector<8x32xi32>
    %16 = arith.cmpi eq, %14, %15 : vector<8x32xi32>
    %17 = arith.extui %16 : vector<8x32xi1> to vector<8x32xi32>
    %18 = arith.sitofp %17 : vector<8x32xi32> to vector<8x32xf32>
    %cst_3 = arith.constant 0.896774172 : f32
    %19 = vector.broadcast %cst_3 : f32 to vector<8x32xf32>
    %20 = arith.mulf %19, %18 : vector<8x32xf32>
    %cst_4 = arith.constant 0.0032258064 : f32
    %21 = vector.broadcast %cst_4 : f32 to vector<8x32xf32>
    %22 = arith.addf %21, %20 : vector<8x32xf32>
    %23 = arith.mulf %0, %22 : vector<8x32xf32>
    %cst_5 = arith.constant dense<0.000000e+00> : vector<8xf32>
    %24 = vector.multi_reduction <add>, %23, %cst_5 [1] : vector<8x32xf32> to vector<8xf32>
    %25 = vector.shape_cast %24 : vector<8xf32> to vector<8x1xf32>
    %26 = arith.subf %9, %25 : vector<8x1xf32>
    %27 = tpu.iota {dimensions = array<i32: 0>} : vector<8x1xi32>
    %28 = vector.broadcast %11 : i32 to vector<8x1xi32>
    %29 = arith.addi %28, %27 : vector<8x1xi32>
    %c8_i32_6 = arith.constant 8 : i32
    %30 = vector.broadcast %c8_i32_6 : i32 to vector<8x1xi32>
    %31 = arith.cmpi slt, %29, %30 : vector<8x1xi32>
    %cst_7 = arith.constant 0.000000e+00 : f32
    %32 = vector.broadcast %cst_7 : f32 to vector<8x1xf32>
    %33 = arith.select %31, %26, %32 : vector<8x1xi1>, vector<8x1xf32>
    %c0_8 = arith.constant 0 : index
    %c0_9 = arith.constant 0 : index
    %34 = vector.load %arg3[%c0_8, %c0_9] : memref<8x1xf32, #tpu.memory_space<vmem>>, vector<8x1xf32>
    tpu.vector_store %arg3[%c0_8, %c0_9], %33 {strides = array<i32>} : memref<8x1xf32, #tpu.memory_space<vmem>>, vector<8x1xf32>,
    return
  }
  func.func @transform_0(%arg0: i32) -> (i32, i32) {
    %c0_i32 = arith.constant 0 : i32
    %c0_i32_0 = arith.constant 0 : i32
    return %arg0, %c0_i32 : i32, i32
  }
  func.func @transform_1(%arg0: i32) -> (i32, i32) {
    %c0_i32 = arith.constant 0 : i32
    %c0_i32_0 = arith.constant 0 : i32
    %c0_i32_1 = arith.constant 0 : i32
    return %c0_i32, %c0_i32_0 : i32, i32
  }
  func.func @transform_2(%arg0: i32) -> (i32, i32) {
    %c0_i32 = arith.constant 0 : i32
    %c0_i32_0 = arith.constant 0 : i32
    return %arg0, %c0_i32 : i32, i32
  }
}

</mosaic_0001>

<bundles_post_ra>
// kernel: tpu_custom_call.1
= control target key start
LH: loop header
LB: loop body
LE: loop exit
PB: predicated region body
PF: predicated region fallthrough
CT: control target
= control target key end

     0   :  { %vm12_vm0 = vcmask 261120   ;;  %v63_v1 = vmov 0   ;;  %v28_v6 = vlaneseq  ;;  %v64_v10 = vmov 0.0   ;;  %s92_s0 = inlined_call_operand.vmem [shape: f32[8,32], index: 0, kind: input, shape index: {}]   ;;  %s93_s1 = inlined_call_operand.vmem [shape: s32[8,1], index: 1, kind: input, shape index: {}]   ;;  %s94_s2 = inlined_call_operand.vmem [shape: f32[8,1], index: 2, kind: output, shape index: {}]  }
   0x1   :  { %v11_v0 = vld [vmem:[%s92_s0] sm:$0xff]  ;;  %58 = vset.pattern.permute.xlu0 %v63_v1  ;;  %vm49_vm2 = vcmask 7168  }
   0x2   :  { %v13_v2 = vsel %vm12_vm0, %v11_v0, -inf  ;;  %v27_v3 = vld [vmem:[%s93_s1] sm:$0xff]  ;;  %v29_v8 = vand.u32 127, %v28_v6 }
   0x3   :  { %14 = vmax.xlane.f32.xlu0 %v13_v2 }
  0x19   :  { %31 = vperm.xlu0 %58, %v27_v3  }
  0x90   :  { %v15_v4 = vpop.xlane.xlu0 %14 }
  0x91   :  { %v16_v5 = vsub.f32 %v11_v0, %v15_v4 }
  0x93   :  { %v17_v7 = vmul.f32 1.442695, %v16_v5 }
  0x95   :  { %59 = vpow2.f32 %v17_v7 }
  0x98   :  { %v32_v9 = vpop.permute.xlu0 %31 }
  0x99   :  { %vm33_vm1 = vcmp.eq.s32.totalorder %v29_v8, %v32_v9 }
  0x9a   :  { %v55_v11 = vsel %vm33_vm1, 1.0, %v64_v10 }
  0x9b   :  { %v36_v12 = vmul.f32 0.8967742, %v55_v11 }
  0x9d   :  { %v37_v13 = vadd.f32 0.0032258064, %v36_v12 }
  0x9f   :  { %v60_v14 = vpop.eup %59  ;;  %v38_v15 = vmul.f32 %v37_v13, %v11_v0 }
  0xa0   :  { %v19_v16 = vsel %vm12_vm0, %v60_v14, 0.0 }
  0xa1   :  { %20 = vadd.xlane.f32.xlu1 %v19_v16  ;;  %v39_v17 = vsel %vm12_vm0, %v38_v15, 0.0 }
  0xa5   :  { %40 = vadd.xlane.f32.xlu1 %v39_v17 }
 0x12e   :  { %v21_v18 = vpop.xlane.xlu1 %20 }
 0x12f   :  { %61 = vlog2.f32 %v21_v18 }
 0x132   :  { %v41_v21 = vpop.xlane.xlu1 %40 }
 0x139   :  { %v62_v19 = vpop.eup %61 }
 0x13a   :  { %v23_v20 = vmul.f32 0.6931472, %v62_v19 }
 0x13c   :  { %v24_v22 = vadd.f32 %v23_v20, %v15_v4 }
 0x13e   :  { %v42_v23 = vsub.f32 %v24_v22, %v41_v21 }
 0x140   :  { %50 = vst.msk [vmem:[%s94_s2] sm:$0xff] %vm49_vm2, %v42_v23 }

</bundles_post_ra>
